<compile_context>
chip_gen: v7x
topology: tpu7x:2x2x1
jax: 0.10.0
libtpu: 0.0.40
codegen_flags: <defaults>
</compile_context>

<pallas_src>
import functools

import jax
import jax.numpy as jnp
import numpy as np
from jax.experimental import pallas as pl
from jax.experimental.pallas import tpu as pltpu


def _round_up(x, m):
    return ((x + m - 1) // m) * m


def _embedder_kernel(x_ref, o_ref, *, freqs, include_input, d):
    """One column-tile of the positional encoding (transposed, lane-dense layout).

    x_ref: (d, tile_cols)       -- points along the lane axis.
    o_ref: (out_dim, tile_cols) -- feature channels along the sublane axis, in
           the PyTorch ordering: [x, sin(f0 x), cos(f0 x), sin(f1 x), ...],
           each block of `d` rows.
    `freqs` is a static tuple of python floats, fully unrolled.
    """
    x = x_ref[...]
    off = 0
    if include_input:
        o_ref[0:d, :] = x
        off = d
    # TODO(synk): if EUP-bound after the layout fix, derive higher power-of-two
    # bands from sin(x)/cos(x) via the double-angle recurrence on the VPU.
    for f in freqs:
        xf = x * jnp.asarray(f, dtype=x.dtype)
        o_ref[off:off + d, :] = jnp.sin(xf)
        o_ref[off + d:off + 2 * d, :] = jnp.cos(xf)
        off += 2 * d


def make_embedder(input_dims=3, num_freqs=4, max_freq_log2=None,
                  log_sampling=True, include_input=True, tile_cols=1024):
    """Returns (embed_fn, out_dim) mirroring Embedder.__init__ kwargs."""
    if max_freq_log2 is None:
        max_freq_log2 = num_freqs - 1

    if log_sampling:
        freq_bands = 2.0 ** np.linspace(0.0, max_freq_log2, num=num_freqs)
    else:
        freq_bands = np.linspace(2.0 ** 0.0, 2.0 ** max_freq_log2, num=num_freqs)
    freqs = tuple(float(f) for f in freq_bands)

    out_dim = (input_dims if include_input else 0) + input_dims * 2 * num_freqs
    assert tile_cols % 128 == 0, "tile_cols must be a multiple of 128 lanes"

    kernel = functools.partial(_embedder_kernel, freqs=freqs,
                               include_input=include_input, d=input_dims)

    @jax.jit
    def _embed_flat(x2d):
        # x2d: (N, input_dims). Compute in the transposed layout (d, N) so N is
        # on the lane axis; pad N up to a multiple of the column tile.
        n = x2d.shape[0]
        tc = min(tile_cols, _round_up(max(n, 1), 128))
        n_pad = _round_up(max(n, 1), tc)

        xt = jnp.transpose(x2d)                      # (d, N)
        if n_pad != n:
            xt = jnp.pad(xt, ((0, 0), (0, n_pad - n)))

        out_t = pl.pallas_call(
            kernel,
            out_shape=jax.ShapeDtypeStruct((out_dim, n_pad), x2d.dtype),
            grid_spec=pltpu.PrefetchScalarGridSpec(
                num_scalar_prefetch=0,
                grid=(n_pad // tc,),
                in_specs=[pl.BlockSpec((input_dims, tc), lambda i: (0, i))],
                out_specs=pl.BlockSpec((out_dim, tc), lambda i: (0, i)),
            ),
            compiler_params=pltpu.CompilerParams(
                dimension_semantics=("parallel",)),
        )(xt)
        return jnp.transpose(out_t[:, :n])           # (N, out_dim)

    def embed(x):
        # Accepts (..., input_dims) like the PyTorch module.
        assert x.shape[-1] == input_dims
        lead = x.shape[:-1]
        out = _embed_flat(x.reshape(-1, input_dims))
        return out.reshape(*lead, out_dim)

    return embed, out_dim


def _reference_embed(x, num_freqs, max_freq_log2, log_sampling, include_input):
    # Pure-JAX reference matching the PyTorch module.
    if log_sampling:
        freqs = 2.0 ** np.linspace(0.0, max_freq_log2, num=num_freqs)
    else:
        freqs = np.linspace(2.0 ** 0.0, 2.0 ** max_freq_log2, num=num_freqs)
    parts = []
    if include_input:
        parts.append(x)
    for f in freqs:
        parts.append(jnp.sin(x * f))
        parts.append(jnp.cos(x * f))
    return jnp.concatenate(parts, axis=-1)


if __name__ == "__main__":
    D = 3
    num_freqs = 4
    max_freq_log2 = num_freqs - 1

    # Case 1: tiny batch (single padded tile).
    x_small = jax.random.normal(jax.random.PRNGKey(0), (16, D), dtype=jnp.float32)
    embed, out_dim = make_embedder(input_dims=D, num_freqs=num_freqs,
                                   max_freq_log2=max_freq_log2,
                                   log_sampling=True, include_input=True,
                                   tile_cols=1024)
    out_small = jax.block_until_ready(embed(x_small))
    ref_small = jax.block_until_ready(
        _reference_embed(x_small, num_freqs, max_freq_log2, True, True))
    assert out_small.shape == (16, out_dim), (out_small.shape, out_dim)
    np.testing.assert_allclose(np.asarray(out_small), np.asarray(ref_small),
                               rtol=1e-6, atol=1e-6)

    # Case 2: ragged N with leading batch dim, multiple grid steps, padded tail.
    embed2, out_dim2 = make_embedder(input_dims=D, num_freqs=num_freqs,
                                     max_freq_log2=max_freq_log2,
                                     log_sampling=True, include_input=True,
                                     tile_cols=128)
    x_big = jax.random.normal(jax.random.PRNGKey(1), (2, 293, D), dtype=jnp.float32)
    out_big = jax.block_until_ready(embed2(x_big))
    ref_big = jax.block_until_ready(
        _reference_embed(x_big, num_freqs, max_freq_log2, True, True))
    assert out_big.shape == (2, 293, out_dim2), (out_big.shape, out_dim2)
    np.testing.assert_allclose(np.asarray(out_big), np.asarray(ref_big),
                               rtol=1e-6, atol=1e-6)

    print("KERNEL_OK")
</pallas_src>

<mosaic_0001>
module attributes {stable_mosaic.version = 11 : i64} {
  func.func @_embedder_kernel(%arg0: i32, %arg1: memref<3x128xf32, #tpu.memory_space<vmem>>, %arg2: memref<27x128xf32, #tpu.memory_space<vmem>>) attributes {dimension_semantics = [#tpu.dimension_semantics<parallel>], iteration_bounds = array<i64: 1>, scalar_prefetch = 0 : i64, scratch_operands = 0 : i64, tpu.core_type = #tpu.core_type<tc>, window_params = [{transform_indices = @transform_0, window_bounds = array<i64: 3, 128>}, {transform_indices = @transform_1, window_bounds = array<i64: 27, 128>}]} {
    %c0 = arith.constant 0 : index
    %c0_0 = arith.constant 0 : index
    %0 = vector.load %arg1[%c0, %c0_0] : memref<3x128xf32, #tpu.memory_space<vmem>>, vector<3x128xf32>
    %c0_1 = arith.constant 0 : index
    %c0_2 = arith.constant 0 : index
    %1 = vector.load %arg2[%c0_1, %c0_2] : memref<27x128xf32, #tpu.memory_space<vmem>>, vector<3x128xf32>
    tpu.vector_store %arg2[%c0_1, %c0_2], %0 {strides = array<i32>} : memref<27x128xf32, #tpu.memory_space<vmem>>, vector<3x128xf32>,
    %cst = arith.constant 1.000000e+00 : f32
    %2 = vector.broadcast %cst : f32 to vector<3x128xf32>
    %3 = arith.mulf %0, %2 : vector<3x128xf32>
    %4 = math.sin %3 : vector<3x128xf32>
    %c3 = arith.constant 3 : index
    %c0_3 = arith.constant 0 : index
    %5 = vector.load %arg2[%c3, %c0_3] : memref<27x128xf32, #tpu.memory_space<vmem>>, vector<3x128xf32>
    tpu.vector_store %arg2[%c3, %c0_3], %4 {strides = array<i32>} : memref<27x128xf32, #tpu.memory_space<vmem>>, vector<3x128xf32>,
    %6 = math.cos %3 : vector<3x128xf32>
    %c6 = arith.constant 6 : index
    %c0_4 = arith.constant 0 : index
    %7 = vector.load %arg2[%c6, %c0_4] : memref<27x128xf32, #tpu.memory_space<vmem>>, vector<3x128xf32>
    tpu.vector_store %arg2[%c6, %c0_4], %6 {strides = array<i32>} : memref<27x128xf32, #tpu.memory_space<vmem>>, vector<3x128xf32>,
    %cst_5 = arith.constant 2.000000e+00 : f32
    %8 = vector.broadcast %cst_5 : f32 to vector<3x128xf32>
    %9 = arith.mulf %0, %8 : vector<3x128xf32>
    %10 = math.sin %9 : vector<3x128xf32>
    %c9 = arith.constant 9 : index
    %c0_6 = arith.constant 0 : index
    %11 = vector.load %arg2[%c9, %c0_6] : memref<27x128xf32, #tpu.memory_space<vmem>>, vector<3x128xf32>
    tpu.vector_store %arg2[%c9, %c0_6], %10 {strides = array<i32>} : memref<27x128xf32, #tpu.memory_space<vmem>>, vector<3x128xf32>,
    %12 = math.cos %9 : vector<3x128xf32>
    %c12 = arith.constant 12 : index
    %c0_7 = arith.constant 0 : index
    %13 = vector.load %arg2[%c12, %c0_7] : memref<27x128xf32, #tpu.memory_space<vmem>>, vector<3x128xf32>
    tpu.vector_store %arg2[%c12, %c0_7], %12 {strides = array<i32>} : memref<27x128xf32, #tpu.memory_space<vmem>>, vector<3x128xf32>,
    %cst_8 = arith.constant 4.000000e+00 : f32
    %14 = vector.broadcast %cst_8 : f32 to vector<3x128xf32>
    %15 = arith.mulf %0, %14 : vector<3x128xf32>
    %16 = math.sin %15 : vector<3x128xf32>
    %c15 = arith.constant 15 : index
    %c0_9 = arith.constant 0 : index
    %17 = vector.load %arg2[%c15, %c0_9] : memref<27x128xf32, #tpu.memory_space<vmem>>, vector<3x128xf32>
    tpu.vector_store %arg2[%c15, %c0_9], %16 {strides = array<i32>} : memref<27x128xf32, #tpu.memory_space<vmem>>, vector<3x128xf32>,
    %18 = math.cos %15 : vector<3x128xf32>
    %c18 = arith.constant 18 : index
    %c0_10 = arith.constant 0 : index
    %19 = vector.load %arg2[%c18, %c0_10] : memref<27x128xf32, #tpu.memory_space<vmem>>, vector<3x128xf32>
    tpu.vector_store %arg2[%c18, %c0_10], %18 {strides = array<i32>} : memref<27x128xf32, #tpu.memory_space<vmem>>, vector<3x128xf32>,
    %cst_11 = arith.constant 8.000000e+00 : f32
    %20 = vector.broadcast %cst_11 : f32 to vector<3x128xf32>
    %21 = arith.mulf %0, %20 : vector<3x128xf32>
    %22 = math.sin %21 : vector<3x128xf32>
    %c21 = arith.constant 21 : index
    %c0_12 = arith.constant 0 : index
    %23 = vector.load %arg2[%c21, %c0_12] : memref<27x128xf32, #tpu.memory_space<vmem>>, vector<3x128xf32>
    tpu.vector_store %arg2[%c21, %c0_12], %22 {strides = array<i32>} : memref<27x128xf32, #tpu.memory_space<vmem>>, vector<3x128xf32>,
    %24 = math.cos %21 : vector<3x128xf32>
    %c24 = arith.constant 24 : index
    %c0_13 = arith.constant 0 : index
    %25 = vector.load %arg2[%c24, %c0_13] : memref<27x128xf32, #tpu.memory_space<vmem>>, vector<3x128xf32>
    tpu.vector_store %arg2[%c24, %c0_13], %24 {strides = array<i32>} : memref<27x128xf32, #tpu.memory_space<vmem>>, vector<3x128xf32>,
    return
  }
  func.func @transform_0(%arg0: i32) -> (i32, i32) {
    %c0_i32 = arith.constant 0 : i32
    %c0_i32_0 = arith.constant 0 : i32
    return %c0_i32, %arg0 : i32, i32
  }
  func.func @transform_1(%arg0: i32) -> (i32, i32) {
    %c0_i32 = arith.constant 0 : i32
    %c0_i32_0 = arith.constant 0 : i32
    return %c0_i32, %arg0 : i32, i32
  }
}

</mosaic_0001>

<bundles_post_ra>
// kernel: _embed_flat.1
= control target key start
LH: loop header
LB: loop body
LE: loop exit
PB: predicated region body
PF: predicated region fallthrough
CT: control target
= control target key end

     0   :  { %v923_v26 = vmov 683565275   ;;  %v924_v28 = vmov 2475754826   ;;  %v925_v30 = vmov 2131351028   ;;  %s1285_s0 = inlined_call_operand.vmem [shape: f32[3,128], index: 0, kind: input, shape index: {}]   ;;  %s1286_s1 = inlined_call_operand.vmem [shape: f32[27,128], index: 1, kind: output, shape index: {}]  }
   0x1   :  { %v942_v0 = vld [vmem:[%s1285_s0] sm:$0x7]  ;;  %v926_v32 = vmov 2102212464   ;;  %v927_v34 = vmov 920167782  }
   0x2   :  { %9 = vst [vmem:[%s1286_s1] sm:$0x7] %v942_v0  ;;  %v10_v1 = vand.u32 2147483647, %v942_v0  ;;  %v13_v2 = vand.u32 2139095040, %v942_v0  ;;  %v951_v3 = vmul.f32 2.0, %v942_v0  ;;  %v954_v4 = vmul.f32 4.0, %v942_v0 }
   0x3   :  { %v928_v41 = vmov 1326507024   ;;  %vm12_vm13 = vcmp.lt.s32.totalorder %v942_v0, 0 }
   0x4   :  { %v14_v5 = vshrl.u32 %v13_v2, 23  ;;  %v17_v6 = vand.u32 8388607, %v10_v1  ;;  %v220_v7 = vand.u32 2147483647, %v951_v3  ;;  %v223_v8 = vand.u32 2139095040, %v951_v3 }
   0x5   :  { %v433_v12 = vand.u32 2139095040, %v954_v4  ;;  %vm1063_vm14 = vcmp.le.f32.partialorder %v10_v1, 0.7853982 }
   0x6   :  { %v853_v9 = vadd.s32 4294967169, %v14_v5  ;;  %v224_v10 = vshrl.u32 %v223_v8, 23  ;;  %v227_v11 = vand.u32 8388607, %v220_v7  ;;  %v18_v14 = vor.u32 8388608, %v17_v6 }
   0x7   :  { %v434_v17 = vshrl.u32 %v433_v12, 23 }
   0x8   :  { %v20_v13 = vadd.s32 1, %v853_v9  ;;  %v861_v15 = vadd.s32 4294967169, %v224_v10  ;;  %v228_v16 = vor.u32 8388608, %v227_v11  ;;  %v963_v22 = vshll.u32 %v18_v14, 8 }
   0x9   :  { %v967_v24 = vadd.s32 4294967169, %v434_v17 }
   0xa   :  { %vm21_vm0 = vcmp.gt.s32.totalorder %v20_v13, 0  ;;  %v230_v19 = vadd.s32 1, %v861_v15  ;;  %v965_v23 = vshll.u32 %v228_v16, 8 }
   0xb   :  { %v22_v18 = vsel %vm21_vm0, %v20_v13, 0 }
   0xc   :  { %v23_v20 = vshrl.u32 %v22_v18, 5  ;;  %v24_v21 = vand.u32 31, %v22_v18  ;;  %vm231_vm1 = vcmp.gt.s32.totalorder %v230_v19, 0 }
   0xd   :  { %v232_v46 = vsel %vm231_vm1, %v230_v19, 0 }
   0xe   :  { %v25_v25 = vsub.s32 32, %v24_v21  ;;  %v27_v27 = vshll.u32 %v923_v26, %v24_v21  ;;  %v30_v29 = vshll.u32 %v924_v28, %v24_v21  ;;  %v33_v31 = vshll.u32 %v925_v30, %v24_v21 }
   0xf   :  { %v36_v33 = vshll.u32 %v926_v32, %v24_v21  ;;  %v39_v35 = vshll.u32 %v927_v34, %v24_v21  ;;  %vm42_vm2 = vcmp.lt.s32.totalorder %v23_v20, 1  ;;  %vm43_vm3 = vcmp.lt.s32.totalorder %v23_v20, 2 }
  0x10   :  { %v26_v36 = vshrl.u32 %v923_v26, %v25_v25  ;;  %v28_v37 = vshrl.u32 %v924_v28, %v25_v25  ;;  %v31_v38 = vshrl.u32 %v925_v30, %v25_v25  ;;  %v34_v39 = vshrl.u32 %v926_v32, %v25_v25 }
  0x11   :  { %v37_v40 = vshrl.u32 %v927_v34, %v25_v25  ;;  %v40_v42 = vshrl.u32 %v928_v41, %v25_v25  ;;  %vm44_vm4 = vcmp.lt.s32.totalorder %v23_v20, 3  ;;  %vm45_vm5 = vcmp.lt.s32.totalorder %v23_v20, 4 }
  0x12   :  { %v29_v43 = vor.u32 %v28_v37, %v27_v27  ;;  %v32_v44 = vor.u32 %v31_v38, %v30_v29  ;;  %v35_v45 = vor.u32 %v34_v39, %v33_v31  ;;  %v233_v49 = vshrl.u32 %v232_v46, 5 }
  0x13   :  { %v38_v47 = vor.u32 %v37_v40, %v36_v33  ;;  %v41_v48 = vor.u32 %v40_v42, %v39_v35  ;;  %v234_v50 = vand.u32 31, %v232_v46  ;;  %v440_v29 = vadd.s32 1, %v967_v24 }
  0x14   :  { %v46_v51 = vsel %vm42_vm2, %v26_v36, %v29_v43  ;;  %v47_v52 = vsel %vm45_vm5, %v35_v45, 2102212464  ;;  %v50_v53 = vsel %vm42_vm2, %v29_v43, %v32_v44  ;;  %v54_v54 = vsel %vm42_vm2, %v32_v44, %v35_v45 }
  0x15   :  { %v48_v55 = vsel %vm44_vm4, %v32_v44, %v47_v52  ;;  %v51_v56 = vsel %vm45_vm5, %v38_v47, 920167782  ;;  %v55_v57 = vsel %vm45_vm5, %v41_v48, 1326507024  ;;  %v235_v58 = vsub.s32 32, %v234_v50 }
  0x16   :  { %v49_v59 = vsel %vm43_vm3, %v46_v51, %v48_v55  ;;  %v52_v60 = vsel %vm44_vm4, %v35_v45, %v51_v56  ;;  %v56_v61 = vsel %vm44_vm4, %v38_v47, %v55_v57  ;;  %v237_v62 = vshll.u32 %v923_v26, %v234_v50 }
  0x17   :  { %v53_v63 = vsel %vm43_vm3, %v50_v53, %v52_v60  ;;  %v57_v2 = vsel %vm43_vm3, %v54_v54, %v56_v61  ;;  %v65_v5 = vmul.u32 %v963_v22, %v49_v59  ;;  %v236_v6 = vshrl.u32 %v923_v26, %v235_v58 }
  0x18   :  { %v994_v8 = vmul.u32.u64.low %v963_v22, %v57_v2  ;;  %v995_v9 = vmul.u32.u64.high %v963_v22, %v57_v2, %v994_v8  ;;  %v998_v10 = vmul.u32.u64.low %v963_v22, %v53_v63  ;;  %v999_v11 = vmul.u32.u64.high %v963_v22, %v53_v63, %v998_v10 }
  0x19   :  { %v238_v12 = vshrl.u32 %v924_v28, %v235_v58  ;;  %v240_v13 = vshll.u32 %v924_v28, %v234_v50  ;;  %v241_v14 = vshrl.u32 %v925_v30, %v235_v58  ;;  %v243_v15 = vshll.u32 %v925_v30, %v234_v50 }
  0x1a   :  { %v244_v16 = vshrl.u32 %v926_v32, %v235_v58  ;;  %v246_v17 = vshll.u32 %v926_v32, %v234_v50  ;;  %v247_v18 = vshrl.u32 %v927_v34, %v235_v58  ;;  %v249_v19 = vshll.u32 %v927_v34, %v234_v50 }
  0x1b   :  { %v239_v20 = vor.u32 %v238_v12, %v237_v62  ;;  %v242_v21 = vor.u32 %v241_v14, %v240_v13  ;;  %v250_v22 = vshrl.u32 %v928_v41, %v235_v58  ;;  %vm252_vm6 = vcmp.lt.s32.totalorder %v233_v49, 1 }
  0x1c   :  { %vm67_vm7 = vc.u32 %v995_v9, %v998_v10  ;;  %v68_v25 = vadd.s32 1, %v999_v11  ;;  %v245_v27 = vor.u32 %v244_v16, %v243_v15  ;;  %v248_v31 = vor.u32 %v247_v18, %v246_v17 }
  0x1d   :  { %v251_v33 = vor.u32 %v250_v22, %v249_v19  ;;  %vm253_vm8 = vcmp.lt.s32.totalorder %v233_v49, 2  ;;  %vm254_vm9 = vcmp.lt.s32.totalorder %v233_v49, 3  ;;  %vm255_vm10 = vcmp.lt.s32.totalorder %v233_v49, 4 }
  0x1e   :  { %v69_v35 = vsel %vm67_vm7, %v68_v25, %v999_v11  ;;  %v256_v36 = vsel %vm252_vm6, %v236_v6, %v239_v20  ;;  %v260_v37 = vsel %vm252_vm6, %v239_v20, %v242_v21  ;;  %v257_v39 = vsel %vm255_vm10, %v245_v27, 2102212464 }
  0x1f   :  { %v70_v38 = vadd.s32 %v69_v35, %v65_v5  ;;  %v261_v40 = vsel %vm255_vm10, %v248_v31, 920167782  ;;  %v264_v42 = vsel %vm252_vm6, %v242_v21, %v245_v27  ;;  %v258_v43 = vsel %vm254_vm9, %v242_v21, %v257_v39 }
  0x20   :  { %v262_v44 = vsel %vm254_vm9, %v245_v27, %v261_v40  ;;  %v265_v45 = vsel %vm255_vm10, %v251_v33, 1326507024  ;;  %vm441_vm11 = vcmp.gt.s32.totalorder %v440_v29, 0  ;;  %v430_v48 = vand.u32 2147483647, %v954_v4 }
  0x21   :  { %v71_v24 = vadd.s32 536870912, %v70_v38  ;;  %v263_v46 = vsel %vm253_vm8, %v260_v37, %v262_v44  ;;  %v266_v47 = vsel %vm254_vm9, %v248_v31, %v265_v45  ;;  %v259_v50 = vsel %vm253_vm8, %v256_v36, %v258_v43 }
  0x22   :  { %v267_v51 = vsel %vm253_vm8, %v264_v42, %v266_v47  ;;  %v1024_v52 = vmul.u32.u64.low %v965_v23, %v263_v46  ;;  %v1025_v53 = vmul.u32.u64.high %v965_v23, %v263_v46, %v1024_v52  ;;  %v442_v57 = vsel %vm441_vm11, %v440_v29, 0 }
  0x23   :  { %v72_v54 = vshrl.u32 %v71_v24, 30  ;;  %v1029_v55 = vmul.u32.u64.low %v965_v23, %v267_v51  ;;  %v1030_v56 = vmul.u32.u64.high %v965_v23, %v267_v51, %v1029_v55  ;;  %v444_v58 = vand.u32 31, %v442_v57 }
  0x24   :  { %v275_v60 = vmul.u32 %v965_v23, %v259_v50  ;;  %v1034_v61 = vmul.f32 8.0, %v942_v0  ;;  %v278_v49 = vadd.s32 1, %v1025_v53  ;;  %v437_v62 = vand.u32 8388607, %v430_v48 }
  0x25   :  { %v73_v59 = vshll.u32 %v72_v54, 30  ;;  %vm277_vm12 = vc.u32 %v1030_v56, %v1024_v52  ;;  %v445_v6 = vsub.s32 32, %v444_v58  ;;  %v96_v13 = vsub.s32 4, %v72_v54 }
  0x26   :  { %v640_v2 = vand.u32 2147483647, %v1034_v61  ;;  %v279_v5 = vsel %vm277_vm12, %v278_v49, %v1025_v53  ;;  %v438_v23 = vor.u32 8388608, %v437_v62  ;;  %v643_v14 = vand.u32 2139095040, %v1034_v61 }
  0x27   :  { %v74_v63 = vsub.s32 %v70_v38, %v73_v59  ;;  %v280_v11 = vadd.s32 %v279_v5, %v275_v60  ;;  %v447_v17 = vshll.u32 %v923_v26, %v444_v58  ;;  %v448_v18 = vshrl.u32 %v924_v28, %v445_v6 }
  0x28   :  { %v1046_v15 = vand.u32 8388607, %v640_v2  ;;  %v450_v19 = vshll.u32 %v924_v28, %v444_v58  ;;  %v451_v21 = vshrl.u32 %v925_v30, %v445_v6  ;;  %v453_v22 = vshll.u32 %v925_v30, %v444_v58 }
  0x29   :  { %v76_v8 = vsub.s32 0, %v74_v63  ;;  %v281_v16 = vadd.s32 536870912, %v280_v11  ;;  %v454_v25 = vshrl.u32 %v926_v32, %v445_v6  ;;  %v66_v27 = vadd.s32 %v998_v10, %v995_v9 }
  0x2a   :  { %v1059_v31 = vshll.u32 %v438_v23, 8  ;;  %v443_v36 = vshrl.u32 %v442_v57, 5  ;;  %v456_v37 = vshll.u32 %v926_v32, %v444_v58  ;;  %v457_v38 = vshrl.u32 %v927_v34, %v445_v6 }
  0x2b   :  { %v854_v12 = vmin.u32 %v76_v8, %v74_v63  ;;  %v1057_v29 = vshrl.u32 %v281_v16, 30  ;;  %v97_v39 = vsel %vm12_vm13, %v96_v13, %v72_v54  ;;  %v644_v10 = vshrl.u32 %v643_v14, 23 }
  0x2c   :  { %v648_v40 = vor.u32 8388608, %v1046_v15  ;;  %v449_v42 = vor.u32 %v448_v18, %v447_v17  ;;  %v452_v1 = vor.u32 %v451_v21, %v450_v19  ;;  %v455_v43 = vor.u32 %v454_v25, %v453_v22 }
  0x2d   :  { %v78_v20 = vclz %v854_v12  ;;  %v283_v9 = vshll.u32 %v1057_v29, 30  ;;  %v459_v24 = vshll.u32 %v927_v34, %v444_v58  ;;  %v460_v46 = vshrl.u32 %v928_v41, %v445_v6 }
  0x2e   :  { %v458_v53 = vor.u32 %v457_v38, %v456_v37  ;;  %v446_v55 = vshrl.u32 %v923_v26, %v445_v6  ;;  %vm462_vm0 = vcmp.lt.s32.totalorder %v443_v36, 1  ;;  %vm465_vm1 = vcmp.lt.s32.totalorder %v443_v36, 4 }
  0x2f   :  { %v855_v35 = vadd.s32 4294967294, %v78_v20  ;;  %v1073_v45 = vsub.s32 %v280_v11, %v283_v9  ;;  %v276_v60 = vadd.s32 %v1024_v52, %v1030_v56  ;;  %v467_v49 = vsel %vm465_vm1, %v455_v43, 2102212464 }
  0x30   :  { %v461_v62 = vor.u32 %v460_v46, %v459_v24  ;;  %vm463_vm2 = vcmp.lt.s32.totalorder %v443_v36, 2  ;;  %vm464_vm3 = vcmp.lt.s32.totalorder %v443_v36, 3  ;;  %v470_v8 = vsel %vm462_vm0, %v449_v42, %v452_v1 }
  0x31   :  { %vm856_vm15 = vcmp.lt.s32.totalorder %v855_v35, 0  ;;  %v286_v54 = vsub.s32 0, %v1073_v45  ;;  %v471_v6 = vsel %vm465_vm1, %v458_v53, 920167782  ;;  %v99_v11 = vsel %vm1063_vm14, 0, %v97_v39 }
  0x32   :  { %v81_v44 = vsel %vm856_vm15, 0, %v855_v35  ;;  %vm222_vm4 = vcmp.lt.s32.totalorder %v951_v3, 0  ;;  %v466_v52 = vsel %vm462_vm0, %v446_v55, %v449_v42  ;;  %v468_v56 = vsel %vm464_vm3, %v452_v1, %v467_v49 }
  0x33   :  { %v82_v47 = vsub.s32 32, %v81_v44  ;;  %v83_v50 = vshll.u32 %v74_v63, %v81_v44  ;;  %v86_v51 = vsub.s32 4294967266, %v81_v44  ;;  %v862_v58 = vmin.u32 %v286_v54, %v1073_v45 }
  0x34   :  { %v472_v14 = vsel %vm464_vm3, %v455_v43, %v471_v6  ;;  %v474_v16 = vsel %vm462_vm0, %v452_v1, %v455_v43  ;;  %v306_v18 = vsub.s32 4, %v1057_v29  ;;  %v475_v20 = vsel %vm465_vm1, %v461_v62, 1326507024 }
  0x35   :  { %v84_v57 = vshrl.u32 %v66_v27, %v82_v47  ;;  %v87_v59 = vadd.s32 127, %v86_v51  ;;  %v288_v23 = vclz %v862_v58  ;;  %v473_v19 = vsel %vm463_vm2, %v470_v8, %v472_v14 }
  0x36   :  { %vm1097_vm5 = vcmp.le.f32.partialorder %v220_v7, 0.7853982  ;;  %v476_v25 = vsel %vm464_vm3, %v458_v53, %v475_v20  ;;  %v1103_v27 = vmul.u32.u64.low %v1059_v31, %v473_v19  ;;  %v1104_v35 = vmul.u32.u64.high %v1059_v31, %v473_v19, %v1103_v27 }
  0x37   :  { %v85_v63 = vor.u32 %v84_v57, %v83_v50  ;;  %v88_v5 = vshll.u32 %v87_v59, 23  ;;  %v863_v17 = vadd.s32 4294967294, %v288_v23  ;;  %v469_v37 = vsel %vm463_vm2, %v466_v52, %v468_v56 }
  0x38   :  { %v477_v38 = vsel %vm463_vm2, %v474_v16, %v476_v25  ;;  %v877_v39 = vadd.s32 4294967169, %v644_v10  ;;  %v103_v50 = vadd.s32 3, %v99_v11  ;;  %v485_v51 = vmul.u32 %v1059_v31, %v469_v37 }
  0x39   :  { %v89_v12 = vor.u32 4788187, %v88_v5  ;;  %v92_v13 = vcvt.s32.f32 %v85_v63  ;;  %vm864_vm6 = vcmp.lt.s32.totalorder %v863_v17, 0  ;;  %v488_v53 = vadd.s32 1, %v1104_v35 }
  0x3a   :  { %v291_v42 = vsel %vm864_vm6, 0, %v863_v17  ;;  %v1110_v7 = vmul.u32.u64.low %v1059_v31, %v477_v38  ;;  %v1111_v1 = vmul.u32.u64.high %v1059_v31, %v477_v38, %v1110_v7  ;;  %v650_v46 = vadd.s32 1, %v877_v39 }
  0x3b   :  { %v90_v21 = vand.u32 2147483647, %v89_v12  ;;  %v292_v43 = vsub.s32 32, %v291_v42  ;;  %v293_v44 = vshll.u32 %v1073_v45, %v291_v42  ;;  %v296_v24 = vsub.s32 4294967266, %v291_v42 }
  0x3c   :  { %v1116_v36 = vand.u32 3, %v99_v11  ;;  %vm651_vm7 = vcmp.gt.s32.totalorder %v650_v46, 0  ;;  %v307_v45 = vsel %vm222_vm4, %v306_v18, %v1057_v29  ;;  %vm487_vm8 = vc.u32 %v1111_v1, %v1103_v27 }
  0x3d   :  { %v93_v9 = vmul.f32 %v92_v13, %v90_v21  ;;  %v294_v10 = vshrl.u32 %v276_v60, %v292_v43  ;;  %v297_v54 = vadd.s32 127, %v296_v24  ;;  %v652_v57 = vsel %vm651_vm7, %v650_v46, 0 }
  0x3e   :  { %v489_v60 = vsel %vm487_vm8, %v488_v53, %v1104_v35  ;;  %v1129_v58 = vand.u32 3, %v103_v50  ;;  %v654_v63 = vand.u32 31, %v652_v57  ;;  %v309_v8 = vsel %vm1097_vm5, 0, %v307_v45 }
  0x3f   :  { %v94_v47 = vxor.u32 2147483648, %v93_v9  ;;  %v295_v59 = vor.u32 %v294_v10, %v293_v44  ;;  %v298_v49 = vshll.u32 %v297_v54, 23  ;;  %v490_v62 = vadd.s32 %v489_v60, %v485_v51 }
  0x40   :  { %v655_v11 = vsub.s32 32, %v654_v63  ;;  %v657_v33 = vshll.u32 %v923_v26, %v654_v63  ;;  %v660_v23 = vshll.u32 %v924_v28, %v654_v63  ;;  %v663_v56 = vshll.u32 %v925_v30, %v654_v63 }
  0x41   :  { %v95_v55 = vsel %vm12_vm13, %v94_v47, %v93_v9  ;;  %v299_v5 = vor.u32 4788187, %v298_v49  ;;  %v302_v29 = vcvt.s32.f32 %v295_v59  ;;  %v491_v6 = vadd.s32 536870912, %v490_v62 }
  0x42   :  { %v98_v31 = vsel %vm1063_vm14, %v942_v0, %v95_v55  ;;  %v666_v12 = vshll.u32 %v926_v32, %v654_v63  ;;  %v1138_v13 = vshll.u32 %v927_v34, %v654_v63  ;;  %v1142_v16 = vshrl.u32 %v652_v57, 5 }
  0x43   :  { %907 = vcosq.f32 %v98_v31  ;;  %v300_v52 = vand.u32 2147483647, %v299_v5  ;;  %v1140_v14 = vshrl.u32 %v491_v6, 30  ;;  %v658_v17 = vshrl.u32 %v924_v28, %v655_v11 }
  0x44   :  { %909 = vsinq.f32 %v98_v31  ;;  %v661_v18 = vshrl.u32 %v925_v30, %v655_v11  ;;  %vm102_vm9 = vweird.f32 %v942_v0  ;;  %v664_v20 = vshrl.u32 %v926_v32, %v655_v11 }
  0x45   :  { %v303_v19 = vmul.f32 %v302_v29, %v300_v52  ;;  %v667_v21 = vshrl.u32 %v927_v34, %v655_v11  ;;  %v670_v25 = vshrl.u32 %v928_v41, %v655_v11  ;;  %v493_v35 = vshll.u32 %v1140_v14, 30 }
  0x46   :  { %v656_v37 = vshrl.u32 %v923_v26, %v655_v11  ;;  %v659_v38 = vor.u32 %v658_v17, %v657_v33  ;;  %v662_v39 = vor.u32 %v661_v18, %v660_v23  ;;  %v665_v42 = vor.u32 %v664_v20, %v663_v56 }
  0x47   :  { %v304_v9 = vxor.u32 2147483648, %v303_v19  ;;  %v668_v28 = vor.u32 %v667_v21, %v666_v12  ;;  %v671_v30 = vor.u32 %v670_v25, %v1138_v13  ;;  %vm209_vm10 = vcmp.lt.s32.totalorder %v1116_v36, 2 }
  0x48   :  { %vm210_vm11 = vcmp.eq.s32.totalorder %v1116_v36, 0  ;;  %v313_v32 = vadd.s32 3, %v309_v8  ;;  %v1155_v7 = vsub.s32 %v490_v62, %v493_v35  ;;  %vm105_vm12 = vcmp.lt.s32.totalorder %v1129_v58, 2 }
  0x49   :  { %vm213_vm13 = vcmp.eq.s32.totalorder %v1116_v36, 2  ;;  %v305_v26 = vsel %vm222_vm4, %v304_v9, %v303_v19  ;;  %v1161_v34 = vand.u32 3, %v309_v8  ;;  %vm109_vm14 = vcmp.eq.s32.totalorder %v1129_v58, 2 }
  0x4a   :  { %v308_v43 = vsel %vm1097_vm5, %v951_v3, %v305_v26  ;;  %v496_v44 = vsub.s32 0, %v1155_v7  ;;  %vm672_vm15 = vcmp.lt.s32.totalorder %v1142_v16, 1  ;;  %vm106_vm0 = vcmp.eq.s32.totalorder %v1129_v58, 0 }
  0x4b   :  { %911 = vcosq.f32 %v308_v43  ;;  %v676_v47 = vsel %vm672_vm15, %v656_v37, %v659_v38  ;;  %v1172_v51 = vand.u32 3, %v313_v32  ;;  %vm423_vm1 = vcmp.eq.s32.totalorder %v1161_v34, 2 }
  0x4c   :  { %913 = vsinq.f32 %v308_v43  ;;  %v870_v53 = vmin.u32 %v496_v44, %v1155_v7  ;;  %vm675_vm2 = vcmp.lt.s32.totalorder %v1142_v16, 4  ;;  %v1181_v54 = vshll.u32 %v648_v40, 8 }
  0x4d   :  { %v908_v41 = vpop.eup %907  ;;  %vm420_vm3 = vcmp.eq.s32.totalorder %v1161_v34, 0  ;;  %v677_v31 = vsel %vm675_vm2, %v665_v42, 2102212464  ;;  %v486_v15 = vadd.s32 %v1103_v27, %v1111_v1  ;;  %vm674_vm4 = vcmp.lt.s32.totalorder %v1142_v16, 3 }
  0x4e   :  { %v910_v24 = vpop.eup %909  ;;  %v110_v46 = vxor.u32 2147483648, %v908_v41  ;;  %v498_v57 = vclz %v870_v53  ;;  %vm312_vm5 = vweird.f32 %v951_v3  ;;  %vm673_vm6 = vcmp.lt.s32.totalorder %v1142_v16, 2 }
  0x4f   :  { %v107_v50 = vxor.u32 2147483648, %v910_v24  ;;  %v678_v27 = vsel %vm674_vm4, %v662_v39, %v677_v31  ;;  %v680_v0 = vsel %vm672_vm15, %v659_v38, %v662_v39  ;;  %v681_v1 = vsel %vm675_vm2, %v668_v28, 920167782 }
  0x50   :  { %v111_v22 = vsel %vm109_vm14, %v110_v46, %v910_v24  ;;  %v215_v10 = vsel %vm213_vm13, %v110_v46, %v910_v24  ;;  %v871_v62 = vadd.s32 4294967294, %v498_v57  ;;  %v684_v36 = vsel %vm672_vm15, %v662_v39, %v665_v42 }
  0x51   :  { %v108_v55 = vsel %vm106_vm0, %v908_v41, %v107_v50  ;;  %v212_v45 = vsel %vm210_vm11, %v908_v41, %v107_v50  ;;  %v679_v58 = vsel %vm673_vm6, %v676_v47, %v678_v27  ;;  %v682_v63 = vsel %vm674_vm4, %v665_v42, %v681_v1 }
  0x52   :  { %v112_v59 = vsel %vm105_vm12, %v108_v55, %v111_v22  ;;  %v216_v49 = vsel %vm209_vm10, %v212_v45, %v215_v10  ;;  %vm872_vm7 = vcmp.lt.s32.totalorder %v871_v62, 0  ;;  %v685_v5 = vsel %vm675_vm2, %v671_v30, 1326507024 }
  0x53   :  { %v113_v40 = vsel %vm102_vm9, nan, %v112_v59  ;;  %v217_v60 = vsel %vm102_vm9, nan, %v216_v49  ;;  %vm319_vm8 = vcmp.eq.s32.totalorder %v1172_v51, 2  ;;  %v501_v29 = vsel %vm872_vm7, 0, %v871_v62 }
  0x54   :  { %114 = vst [vmem:[%s1286_s1 + $0x3] sm:$0x7] %v113_v40  ;;  %218 = vst [vmem:[%s1286_s1 + $0x6] sm:$0x7] %v217_v60  ;;  %v683_v8 = vsel %vm673_vm6, %v680_v0, %v682_v63  ;;  %v686_v6 = vsel %vm674_vm4, %v668_v28, %v685_v5  ;;  %v502_v11 = vsub.s32 32, %v501_v29  ;;  %v503_v33 = vshll.u32 %v1155_v7, %v501_v29 }
  0x55   :  { %v506_v23 = vsub.s32 4294967266, %v501_v29  ;;  %v687_v52 = vsel %vm673_vm6, %v684_v36, %v686_v6  ;;  %v912_v56 = vpop.eup %911  ;;  %v1234_v17 = vmul.u32.u64.low %v1181_v54, %v683_v8  ;;  %v1235_v18 = vmul.u32.u64.high %v1181_v54, %v683_v8, %v1234_v17 }
  0x56   :  { %v1230_v12 = vmul.u32.u64.low %v1181_v54, %v687_v52  ;;  %v1231_v13 = vmul.u32.u64.high %v1181_v54, %v687_v52, %v1230_v12  ;;  %v914_v19 = vpop.eup %913  ;;  %vm316_vm9 = vcmp.eq.s32.totalorder %v1172_v51, 0  ;;  %v320_v20 = vxor.u32 2147483648, %v912_v56 }
  0x57   :  { %v504_v21 = vshrl.u32 %v486_v15, %v502_v11  ;;  %v507_v25 = vadd.s32 127, %v506_v23  ;;  %vm315_vm10 = vcmp.lt.s32.totalorder %v1172_v51, 2  ;;  %v317_v35 = vxor.u32 2147483648, %v914_v19 }
  0x58   :  { %vm419_vm11 = vcmp.lt.s32.totalorder %v1161_v34, 2  ;;  %v695_v16 = vmul.u32 %v1181_v54, %v679_v58  ;;  %v321_v37 = vsel %vm319_vm8, %v320_v20, %v914_v19  ;;  %v425_v38 = vsel %vm423_vm1, %v320_v20, %v914_v19 }
  0x59   :  { %v505_v39 = vor.u32 %v504_v21, %v503_v33  ;;  %v508_v9 = vshll.u32 %v507_v25, 23  ;;  %v318_v42 = vsel %vm316_vm9, %v912_v56, %v317_v35  ;;  %v422_v28 = vsel %vm420_vm3, %v912_v56, %v317_v35 }
  0x5a   :  { %v696_v30 = vadd.s32 %v1234_v17, %v1231_v13  ;;  %vm697_vm12 = vc.u32 %v1231_v13, %v1234_v17  ;;  %v322_v32 = vsel %vm315_vm10, %v318_v42, %v321_v37  ;;  %v426_v7 = vsel %vm419_vm11, %v422_v28, %v425_v38 }
  0x5b   :  { %v509_v26 = vor.u32 4788187, %v508_v9  ;;  %v512_v41 = vcvt.s32.f32 %v505_v39  ;;  %v323_v43 = vsel %vm312_vm5, nan, %v322_v32  ;;  %v427_v44 = vsel %vm312_vm5, nan, %v426_v7 }
  0x5c   :  { %v698_v24 = vadd.s32 1, %v1235_v18  ;;  %324 = vst [vmem:[%s1286_s1 + $0x9] sm:$0x7] %v323_v43  ;;  %428 = vst [vmem:[%s1286_s1 + $0xc] sm:$0x7] %v427_v44  ;;  %v516_v46 = vsub.s32 4, %v1140_v14  ;;  %vm522_vm6 = vweird.f32 %v954_v4 }
  0x5d   :  { %v510_v34 = vand.u32 2147483647, %v509_v26  ;;  %vm432_vm13 = vcmp.lt.s32.totalorder %v954_v4, 0  ;;  %vm431_vm14 = vcmp.le.f32.partialorder %v430_v48, 0.7853982  ;;  %vm642_vm7 = vcmp.lt.s32.totalorder %v1034_v61, 0 }
  0x5e   :  { %v699_v47 = vsel %vm697_vm12, %v698_v24, %v1235_v18  ;;  %v517_v53 = vsel %vm432_vm13, %v516_v46, %v1140_v14  ;;  %vm641_vm8 = vcmp.le.f32.partialorder %v640_v2, 0.7853982 }
  0x5f   :  { %v513_v50 = vmul.f32 %v512_v41, %v510_v34  ;;  %v700_v51 = vadd.s32 %v699_v47, %v695_v16  ;;  %v519_v45 = vsel %vm431_vm14, 0, %v517_v53 }
  0x60   :  { %v523_v31 = vadd.s32 3, %v519_v45  ;;  %v628_v40 = vand.u32 3, %v519_v45 }
  0x61   :  { %v514_v3 = vxor.u32 2147483648, %v513_v50  ;;  %v701_v22 = vadd.s32 536870912, %v700_v51 }
  0x62   :  { %v524_v15 = vand.u32 3, %v523_v31  ;;  %vm633_vm0 = vcmp.eq.s32.totalorder %v628_v40, 2  ;;  %vm630_vm2 = vcmp.eq.s32.totalorder %v628_v40, 0  ;;  %vm629_vm4 = vcmp.lt.s32.totalorder %v628_v40, 2 }
  0x63   :  { %v515_v10 = vsel %vm432_vm13, %v514_v3, %v513_v50  ;;  %v702_v54 = vshrl.u32 %v701_v22, 30 }
  0x64   :  { %v518_v55 = vsel %vm431_vm14, %v954_v4, %v515_v10  ;;  %vm529_vm15 = vcmp.eq.s32.totalorder %v524_v15, 2  ;;  %vm526_vm1 = vcmp.eq.s32.totalorder %v524_v15, 0  ;;  %vm525_vm3 = vcmp.lt.s32.totalorder %v524_v15, 2 }
  0x65   :  { %915 = vcosq.f32 %v518_v55  ;;  %v703_v57 = vshll.u32 %v702_v54, 30  ;;  %v726_v21 = vsub.s32 4, %v702_v54 }
  0x66   :  { %917 = vsinq.f32 %v518_v55 }
  0x67   :  { %v704_v59 = vsub.s32 %v700_v51, %v703_v57  ;;  %v727_v16 = vsel %vm642_vm7, %v726_v21, %v702_v54 }
  0x68   :  { %v729_v39 = vsel %vm641_vm8, 0, %v727_v16 }
  0x69   :  { %v706_v49 = vsub.s32 0, %v704_v59  ;;  %v733_v9 = vadd.s32 3, %v729_v39  ;;  %v838_v28 = vand.u32 3, %v729_v39 }
  0x6b   :  { %v878_v60 = vmin.u32 %v706_v49, %v704_v59  ;;  %v734_v42 = vand.u32 3, %v733_v9  ;;  %vm843_vm10 = vcmp.eq.s32.totalorder %v838_v28, 2  ;;  %vm840_vm12 = vcmp.eq.s32.totalorder %v838_v28, 0 }
  0x6c   :  { %vm839_vm14 = vcmp.lt.s32.totalorder %v838_v28, 2 }
  0x6d   :  { %v708_v62 = vclz %v878_v60  ;;  %vm739_vm9 = vcmp.eq.s32.totalorder %v734_v42, 2  ;;  %vm736_vm11 = vcmp.eq.s32.totalorder %v734_v42, 0  ;;  %vm735_vm13 = vcmp.lt.s32.totalorder %v734_v42, 2 }
  0x6f   :  { %v916_v48 = vpop.eup %915  ;;  %v879_v14 = vadd.s32 4294967294, %v708_v62 }
  0x70   :  { %v918_v27 = vpop.eup %917  ;;  %v530_v0 = vxor.u32 2147483648, %v916_v48 }
  0x71   :  { %v527_v1 = vxor.u32 2147483648, %v918_v27  ;;  %vm880_vm5 = vcmp.lt.s32.totalorder %v879_v14, 0 }
  0x72   :  { %v531_v36 = vsel %vm529_vm15, %v530_v0, %v918_v27  ;;  %v635_v58 = vsel %vm633_vm0, %v530_v0, %v918_v27  ;;  %v711_v63 = vsel %vm880_vm5, 0, %v879_v14  ;;  %vm732_vm15 = vweird.f32 %v1034_v61 }
  0x73   :  { %v528_v5 = vsel %vm526_vm1, %v916_v48, %v527_v1  ;;  %v632_v29 = vsel %vm630_vm2, %v916_v48, %v527_v1  ;;  %v712_v8 = vsub.s32 32, %v711_v63  ;;  %v713_v6 = vshll.u32 %v704_v59, %v711_v63 }
  0x74   :  { %v532_v11 = vsel %vm525_vm3, %v528_v5, %v531_v36  ;;  %v636_v33 = vsel %vm629_vm4, %v632_v29, %v635_v58  ;;  %v716_v23 = vsub.s32 4294967266, %v711_v63 }
  0x75   :  { %v533_v52 = vsel %vm522_vm6, nan, %v532_v11  ;;  %v637_v56 = vsel %vm522_vm6, nan, %v636_v33  ;;  %v714_v12 = vshrl.u32 %v696_v30, %v712_v8 }
  0x76   :  { %534 = vst [vmem:[%s1286_s1 + $0xf] sm:$0x7] %v533_v52  ;;  %638 = vst [vmem:[%s1286_s1 + $0x12] sm:$0x7] %v637_v56  ;;  %v717_v4 = vadd.s32 127, %v716_v23 }
  0x77   :  { %v715_v13 = vor.u32 %v714_v12, %v713_v6 }
  0x78   :  { %v718_v17 = vshll.u32 %v717_v4, 23 }
  0x79   :  { %v722_v19 = vcvt.s32.f32 %v715_v13 }
  0x7a   :  { %v719_v18 = vor.u32 4788187, %v718_v17 }
  0x7c   :  { %v720_v20 = vand.u32 2147483647, %v719_v18 }
  0x7e   :  { %v723_v25 = vmul.f32 %v722_v19, %v720_v20 }
  0x80   :  { %v724_v35 = vxor.u32 2147483648, %v723_v25 }
  0x82   :  { %v725_v37 = vsel %vm642_vm7, %v724_v35, %v723_v25 }
  0x83   :  { %v728_v38 = vsel %vm641_vm8, %v1034_v61, %v725_v37 }
  0x84   :  { %919 = vcosq.f32 %v728_v38 }
  0x85   :  { %921 = vsinq.f32 %v728_v38 }
  0x8e   :  { %v920_v30 = vpop.eup %919 }
  0x8f   :  { %v922_v32 = vpop.eup %921  ;;  %v740_v7 = vxor.u32 2147483648, %v920_v30 }
  0x90   :  { %v737_v2 = vxor.u32 2147483648, %v922_v32 }
  0x91   :  { %v741_v26 = vsel %vm739_vm9, %v740_v7, %v922_v32  ;;  %v845_v41 = vsel %vm843_vm10, %v740_v7, %v922_v32 }
  0x92   :  { %v738_v43 = vsel %vm736_vm11, %v920_v30, %v737_v2  ;;  %v842_v44 = vsel %vm840_vm12, %v920_v30, %v737_v2 }
  0x93   :  { %v742_v24 = vsel %vm735_vm13, %v738_v43, %v741_v26  ;;  %v846_v34 = vsel %vm839_vm14, %v842_v44, %v845_v41 }
  0x94   :  { %v743_v46 = vsel %vm732_vm15, nan, %v742_v24  ;;  %v847_v47 = vsel %vm732_vm15, nan, %v846_v34 }
  0x95   :  { %744 = vst [vmem:[%s1286_s1 + $0x15] sm:$0x7] %v743_v46  ;;  %848 = vst [vmem:[%s1286_s1 + $0x18] sm:$0x7] %v847_v47 }

</bundles_post_ra>
